<compile_context>
chip_gen: v7x
topology: tpu7x:2x2x1
jax: 0.10.0
libtpu: 0.0.40
codegen_flags: <defaults>
</compile_context>

<pallas_src>
import numpy as np
import jax
import jax.numpy as jnp
from jax import lax
from jax.experimental import pallas as pl
from jax.experimental.pallas import tpu as pltpu

EPS = 1e-5

# Packed-lane layout of the fused "x-side" weight WX (shape (D, 32)):
#   cols  0:16 -> fc1 weight (bn3 folded)          => u[:, 0:16] = fc1(x) pre-relu
#   cols 16:24 -> fc2's x-half weight (bn3 folded) => u[:,16:24] = x-part of fc2
#   col  24    -> out's x-half weight (bn3 folded) => u[:,  24 ] = x-part of out (+bias)
#   cols 25:32 -> zero padding
H1, H2, WXW = 16, 8, 32  # fc1 width, fc2 width, packed lane width


def _make_kernel(chunk):
    """Kernel computing one (tile_rows, D) batch tile in `chunk`-row sub-chunks."""

    def mlp_kernel(x_ref, wxb_ref, w23_ref, o_ref):
        tn, d = x_ref.shape
        n_chunks = tn // chunk  # exact by construction in _plan_tiles

        # Loop-invariant packed params, hoisted out of the chunk loop.
        wx = wxb_ref[0:d, :]                   # (D, 32)  fc1 | fc2-x-half | out-x-half
        bx = wxb_ref[d:d + 1, :]               # (1, 32)  packed folded biases
        w2 = w23_ref[0:H1, :]                  # (16, 16) fc2 hidden-half (cols 0:8)
        w3 = w23_ref[H1:H1 + 1, :]             # (1, 16)  single needed out-layer row

        def compute(xc):
            rows = xc.shape[0]
            # One MXU pass of x against all three x-consuming weights (+ biases).
            u = jnp.dot(xc, wx, preferred_element_type=jnp.float32) + bx      # (C, 32)
            # fc1 -> ReLU (bn1/bn3 folded into weights/biases; dropout = id in eval).
            r1 = jnp.maximum(u[:, 0:H1], 0.0)                                  # (C, 16)
            # fc2: hidden half via MXU, x half comes from u.
            #   v[:,0:8] = fc2 pre-relu, v[:,8] = out-layer x term (+bias), v[:,9:16] = 0
            v = jnp.dot(r1, w2, preferred_element_type=jnp.float32) + u[:, H1:WXW]
            # ReLU only the fc2 lanes; lane 8 carries the out-layer x term untouched.
            # iota < 8 is a compile-time constant mask (static shapes).
            keep = lax.broadcasted_iota(jnp.int32, (rows, WXW - H1), 1) < H2
            h = jnp.where(keep, jnp.maximum(v, 0.0), v)                        # (C, 16)
            # out layer, lane-dense transposed form: (1,16) contracted with (C,16) -> (1,C)
            #   row 0 of w3 = [out weights (8), 1.0 (picks up x term + bias), zeros]
            return lax.dot_general(w3, h, (((1,), (1,)), ((), ())),
                                   preferred_element_type=jnp.float32)        # (1, C)

        if n_chunks == 1:
            # Single chunk: fully static indexing.
            o_ref[...] = compute(x_ref[...]).reshape(1, 1, tn)
        else:
            # Multi-chunk: bounded temporaries regardless of tile size.
            # `chunk` is a multiple of 128 here, so dynamic lane-dim store
            # offsets stay 128-aligned (unmasked vst).
            def chunk_body(c, carry):
                r0 = pl.multiple_of(c * chunk, chunk)
                z = compute(x_ref[pl.ds(r0, chunk), :])
                o_ref[:, :, pl.ds(r0, chunk)] = z.reshape(1, 1, chunk)
                return carry

            lax.fori_loop(0, n_chunks, chunk_body, 0)

    return mlp_kernel


def _round_up(n, m):
    return ((n + m - 1) // m) * m


def _plan_tiles(n, block_rows, chunk_rows):
    """Pick (num_tiles, tile_rows, chunk) such that:
       * tile_rows is a multiple of chunk (exact in-kernel chunk loop),
       * dynamic lane-dim store offsets are 128-aligned whenever multi-chunk,
       * batch padding waste stays small (< one chunk per tile)."""
    chunk = _round_up(min(chunk_rows, block_rows, max(n, 8)), 8)
    num_tiles = max(1, -(-n // block_rows))
    tile = _round_up(-(-n // num_tiles), chunk)
    if tile > chunk and chunk % 128:
        chunk = _round_up(chunk, 128)
        tile = _round_up(tile, chunk)
    return num_tiles, tile, chunk


def _vmem_limit_bytes(tile_rows, d, itemsize):
    # x tile (double-buffered) + transposed output tile (double-buffered)
    # + packed weights + per-chunk temporaries, with headroom.  Floor at the
    # 32 MiB default scoped limit (raises v5e's 16 MiB default); cap at 48 MiB
    # so we never exceed v7x's 64 MiB physical VMEM per TensorCore.
    need = 2 * tile_rows * d * itemsize + 2 * tile_rows * 4 + (4 << 20)
    return int(min(48 << 20, max(32 << 20, need)))


def _batch_axis_semantics():
    """v7x needs CORE_PARALLEL for real 2-TensorCore sharding of the batch grid
    axis; plain "parallel" is the safe default elsewhere (single-TC v5e/v6e,
    megacore v4/v5p)."""
    try:
        kind = jax.devices()[0].device_kind.lower().replace(" ", "")
    except Exception:
        kind = ""
    if "v7" in kind or "tpu7" in kind:
        return (pltpu.CORE_PARALLEL,)
    return ("parallel",)


def mlp_forward(x, wxb, w23, *, block_rows=32768, chunk_rows=512):
    """Fused MLP forward over a [N, D] float32 batch using packed/folded params."""
    n, d = x.shape
    num_tiles, tile, chunk = _plan_tiles(n, block_rows, chunk_rows)
    n_pad = num_tiles * tile
    if n_pad != n:
        x = jnp.pad(x, ((0, n_pad - n), (0, 0)))

    out = pl.pallas_call(
        _make_kernel(chunk),
        out_shape=jax.ShapeDtypeStruct((num_tiles, 1, tile), jnp.float32),
        grid=(num_tiles,),
        in_specs=[
            # x: tiled over batch; big tiles amortize the ~0.35us/step overhead.
            # (pipeline_mode=pl.Buffered(3) is a one-line sweep if the DMA is
            # still exposed at this tile size — unlikely at multi-MiB tiles.)
            pl.BlockSpec((tile, d), lambda i: (i, 0)),
            # packed weights: VMEM-resident across the whole grid.
            pl.BlockSpec((d + 1, WXW), lambda i: (0, 0)),
            pl.BlockSpec((H1 + H2, 16), lambda i: (0, 0)),
        ],
        out_specs=pl.BlockSpec((1, 1, tile), lambda i: (i, 0, 0)),
        compiler_params=pltpu.CompilerParams(
            dimension_semantics=_batch_axis_semantics(),
            vmem_limit_bytes=_vmem_limit_bytes(tile, d, x.dtype.itemsize)),
    )(x, wxb, w23)
    return out.reshape(n_pad, 1)[:n]


def init_raw_params(key, input_size):
    """Raw parameters matching the PyTorch module (BN buffers = running stats)."""
    ks = jax.random.split(key, 9)
    f32 = jnp.float32
    d = input_size

    def lin(kw, kb, fan_in, fan_out):
        bound = 1.0 / np.sqrt(fan_in)
        w = jax.random.uniform(kw, (fan_in, fan_out), f32, -bound, bound)
        b = jax.random.uniform(kb, (fan_out,), f32, -bound, bound)
        return w, b

    def bn(k4, feat):
        kg, kb, km, kv = jax.random.split(k4, 4)
        gamma = jax.random.uniform(kg, (feat,), f32, 0.5, 1.5)
        beta = jax.random.uniform(kb, (feat,), f32, -0.5, 0.5)
        mean = jax.random.uniform(km, (feat,), f32, -0.5, 0.5)
        var = jax.random.uniform(kv, (feat,), f32, 0.5, 1.5)
        return (gamma, beta, mean, var)

    w1, b1 = lin(ks[0], ks[1], d, H1)
    w2, b2 = lin(ks[2], ks[3], H1 + d, H2)
    w3, b3 = lin(ks[4], ks[5], H2 + d, 1)
    return {"w1": w1, "b1": b1, "w2": w2, "b2": b2, "w3": w3, "b3": b3,
            "bn1": bn(ks[6], H1), "bn2": bn(ks[7], H2), "bn3": bn(ks[8], d)}


def fold_and_pack_params(p):
    """Fold eval-mode BatchNorms into the linear weights and pack everything into
    two small arrays:  wxb [D+1, 32] and w23 [24, 16]."""
    d = p["w1"].shape[0]

    def scale_shift(bn):
        g, b, m, v = bn
        s = g / jnp.sqrt(v + EPS)
        return s, b - m * s

    s1, t1 = scale_shift(p["bn1"])
    s2, t2 = scale_shift(p["bn2"])
    s3, t3 = scale_shift(p["bn3"])

    w2a, w2b = p["w2"][:H1], p["w2"][H1:]
    w3a, w3b = p["w3"][:H2], p["w3"][H2:]

    w1f = p["w1"] * s3[:, None]                 # (D, 16)
    b1f = p["b1"] + t3 @ p["w1"]                # (16,)
    w2af = w2a * s1[:, None]                    # (16, 8)
    w2bf = w2b * s3[:, None]                    # (D, 8)
    b2f = p["b2"] + t1 @ w2a + t3 @ w2b         # (8,)
    w3af = w3a * s2[:, None]                    # (8, 1)
    w3bf = w3b * s3[:, None]                    # (D, 1)
    b3f = p["b3"] + t2 @ w3a + t3 @ w3b         # (1,)

    wx = jnp.zeros((d, WXW), jnp.float32)
    wx = wx.at[:, 0:H1].set(w1f)
    wx = wx.at[:, H1:H1 + H2].set(w2bf)
    wx = wx.at[:, H1 + H2:H1 + H2 + 1].set(w3bf)
    bx = jnp.zeros((1, WXW), jnp.float32)
    bx = bx.at[0, 0:H1].set(b1f)
    bx = bx.at[0, H1:H1 + H2].set(b2f)
    bx = bx.at[0, H1 + H2].set(b3f[0])
    wxb = jnp.concatenate([wx, bx], axis=0)     # (D+1, 32)

    w2p = jnp.zeros((H1, 16), jnp.float32).at[:, 0:H2].set(w2af)
    w3p = jnp.zeros((H2, 16), jnp.float32)
    w3p = w3p.at[0, 0:H2].set(w3af[:, 0]).at[0, H2].set(1.0)
    w23 = jnp.concatenate([w2p, w3p], axis=0)   # (24, 16)
    return wxb, w23


def mlp_reference(x, p):
    """Pure-JAX reference implementing the original (unfolded) eval-mode math."""
    def bn(h, prm):
        g, b, m, v = prm
        return (h - m) / jnp.sqrt(v + EPS) * g + b
    xb = bn(x, p["bn3"])
    x1 = bn(jnp.maximum(xb @ p["w1"] + p["b1"], 0.0), p["bn1"])   # dropout = identity
    x2 = jnp.concatenate([x1, xb], axis=1)
    x3 = bn(jnp.maximum(x2 @ p["w2"] + p["b2"], 0.0), p["bn2"])   # dropout = identity
    x3 = jnp.concatenate([x3, xb], axis=1)
    return x3 @ p["w3"] + p["b3"]


if __name__ == "__main__":
    key = jax.random.PRNGKey(0)
    kx1, kx2, kx3, kp = jax.random.split(key, 4)

    d = 32
    raw = init_raw_params(kp, d)
    wxb, w23 = fold_and_pack_params(raw)

    # Small single-tile, single-chunk case (batch=8, input_size=32).
    x_small = jax.random.normal(kx1, (8, d), jnp.float32)
    out_small = jax.block_until_ready(mlp_forward(x_small, wxb, w23))
    assert out_small.shape == (8, 1)
    np.testing.assert_allclose(np.asarray(out_small),
                               np.asarray(mlp_reference(x_small, raw)),
                               rtol=1e-4, atol=1e-4)

    # Multi-tile case exercising the grid, batch padding and lane-dense output.
    x_mid = jax.random.normal(kx2, (300, d), jnp.float32)
    out_mid = jax.block_until_ready(mlp_forward(x_mid, wxb, w23, block_rows=128))
    assert out_mid.shape == (300, 1)
    np.testing.assert_allclose(np.asarray(out_mid),
                               np.asarray(mlp_reference(x_mid, raw)),
                               rtol=1e-4, atol=1e-4)

    # Multi-tile + multi-chunk case exercising the in-kernel sub-chunk loop.
    x_big = jax.random.normal(kx3, (2048, d), jnp.float32)
    out_big = jax.block_until_ready(
        mlp_forward(x_big, wxb, w23, block_rows=1024, chunk_rows=256))
    assert out_big.shape == (2048, 1)
    np.testing.assert_allclose(np.asarray(out_big),
                               np.asarray(mlp_reference(x_big, raw)),
                               rtol=1e-4, atol=1e-4)

    print("KERNEL_OK")
</pallas_src>

<mosaic_0001>
module attributes {stable_mosaic.version = 11 : i64} {
  func.func @mlp_kernel(%arg0: i32, %arg1: memref<8x32xf32, #tpu.memory_space<vmem>>, %arg2: memref<33x32xf32, #tpu.memory_space<vmem>>, %arg3: memref<24x16xf32, #tpu.memory_space<vmem>>, %arg4: memref<1x1x8xf32, #tpu.memory_space<vmem>>) attributes {dimension_semantics = [#tpu.dimension_semantics<parallel>], iteration_bounds = array<i64: 1>, scalar_prefetch = 0 : i64, scratch_operands = 0 : i64, tpu.core_type = #tpu.core_type<tc>, window_params = [{transform_indices = @transform_0, window_bounds = array<i64: 8, 32>}, {pipeline_mode = #tpu.pipeline_mode<synchronous>, transform_indices = @transform_1, window_bounds = array<i64: 33, 32>}, {pipeline_mode = #tpu.pipeline_mode<synchronous>, transform_indices = @transform_2, window_bounds = array<i64: 24, 16>}, {transform_indices = @transform_3, window_bounds = array<i64: 1, 1, 8>}]} {
    %c0 = arith.constant 0 : index
    %c0_0 = arith.constant 0 : index
    %0 = vector.load %arg2[%c0, %c0_0] : memref<33x32xf32, #tpu.memory_space<vmem>>, vector<32x32xf32>
    %c32 = arith.constant 32 : index
    %c0_1 = arith.constant 0 : index
    %1 = vector.load %arg2[%c32, %c0_1] : memref<33x32xf32, #tpu.memory_space<vmem>>, vector<1x32xf32>
    %c0_2 = arith.constant 0 : index
    %c0_3 = arith.constant 0 : index
    %2 = vector.load %arg3[%c0_2, %c0_3] : memref<24x16xf32, #tpu.memory_space<vmem>>, vector<16x16xf32>
    %c16 = arith.constant 16 : index
    %c0_4 = arith.constant 0 : index
    %3 = vector.load %arg3[%c16, %c0_4] : memref<24x16xf32, #tpu.memory_space<vmem>>, vector<1x16xf32>
    %c0_5 = arith.constant 0 : index
    %c0_6 = arith.constant 0 : index
    %4 = vector.load %arg1[%c0_5, %c0_6] : memref<8x32xf32, #tpu.memory_space<vmem>>, vector<8x32xf32>
    %cst = arith.constant dense<0.000000e+00> : vector<8x32xf32>
    %5 = tpu.matmul %4, %0, %cst {dimension_numbers = #tpu.dot_dimension_numbers<[1], [0], [0], [1], [0, 0, 1, 1], [], []>} : vector<8x32xf32>, vector<32x32xf32>, vector<8x32xf32> -> vector<8x32xf32>
    %6 = vector.broadcast %1 : vector<1x32xf32> to vector<8x32xf32>
    %7 = arith.addf %5, %6 : vector<8x32xf32>
    %8 = vector.extract_strided_slice %7 {offsets = [0, 0], sizes = [8, 16], strides = [1, 1]} : vector<8x32xf32> to vector<8x16xf32>
    %cst_7 = arith.constant 0.000000e+00 : f32
    %9 = vector.broadcast %cst_7 : f32 to vector<8x16xf32>
    %10 = arith.maximumf %8, %9 : vector<8x16xf32>
    %cst_8 = arith.constant dense<0.000000e+00> : vector<8x16xf32>
    %11 = tpu.matmul %10, %2, %cst_8 {dimension_numbers = #tpu.dot_dimension_numbers<[1], [0], [0], [1], [0, 0, 1, 1], [], []>} : vector<8x16xf32>, vector<16x16xf32>, vector<8x16xf32> -> vector<8x16xf32>
    %12 = vector.extract_strided_slice %7 {offsets = [0, 16], sizes = [8, 16], strides = [1, 1]} : vector<8x32xf32> to vector<8x16xf32>
    %13 = arith.addf %11, %12 : vector<8x16xf32>
    %14 = tpu.iota {dimensions = array<i32: 1>} : vector<8x16xi32>
    %c8_i32 = arith.constant 8 : i32
    %15 = vector.broadcast %c8_i32 : i32 to vector<8x16xi32>
    %16 = arith.cmpi slt, %14, %15 : vector<8x16xi32>
    %cst_9 = arith.constant 0.000000e+00 : f32
    %17 = vector.broadcast %cst_9 : f32 to vector<8x16xf32>
    %18 = arith.maximumf %13, %17 : vector<8x16xf32>
    %19 = arith.select %16, %18, %13 : vector<8x16xi1>, vector<8x16xf32>
    %cst_10 = arith.constant dense<0.000000e+00> : vector<1x8xf32>
    %20 = tpu.matmul %3, %19, %cst_10 {dimension_numbers = #tpu.dot_dimension_numbers<[1], [1], [0], [0], [0, 0, 1, 0], [], []>} : vector<1x16xf32>, vector<8x16xf32>, vector<1x8xf32> -> vector<1x8xf32>
    %21 = vector.shape_cast %20 : vector<1x8xf32> to vector<1x1x8xf32>
    %c0_11 = arith.constant 0 : index
    %c0_12 = arith.constant 0 : index
    %c0_13 = arith.constant 0 : index
    %22 = vector.load %arg4[%c0_11, %c0_12, %c0_13] : memref<1x1x8xf32, #tpu.memory_space<vmem>>, vector<1x1x8xf32>
    tpu.vector_store %arg4[%c0_11, %c0_12, %c0_13], %21 {strides = array<i32>} : memref<1x1x8xf32, #tpu.memory_space<vmem>>, vector<1x1x8xf32>,
    return
  }
  func.func @transform_0(%arg0: i32) -> (i32, i32) {
    %c0_i32 = arith.constant 0 : i32
    %c0_i32_0 = arith.constant 0 : i32
    return %arg0, %c0_i32 : i32, i32
  }
  func.func @transform_1(%arg0: i32) -> (i32, i32) {
    %c0_i32 = arith.constant 0 : i32
    %c0_i32_0 = arith.constant 0 : i32
    %c0_i32_1 = arith.constant 0 : i32
    return %c0_i32, %c0_i32_0 : i32, i32
  }
  func.func @transform_2(%arg0: i32) -> (i32, i32) {
    %c0_i32 = arith.constant 0 : i32
    %c0_i32_0 = arith.constant 0 : i32
    %c0_i32_1 = arith.constant 0 : i32
    return %c0_i32, %c0_i32_0 : i32, i32
  }
  func.func @transform_3(%arg0: i32) -> (i32, i32, i32) {
    %c0_i32 = arith.constant 0 : i32
    %c0_i32_0 = arith.constant 0 : i32
    %c0_i32_1 = arith.constant 0 : i32
    return %arg0, %c0_i32, %c0_i32_0 : i32, i32, i32
  }
}

</mosaic_0001>

<bundles_post_ra>
// kernel: tpu_custom_call.1
= control target key start
LH: loop header
LB: loop body
LE: loop exit
PB: predicated region body
PF: predicated region fallthrough
CT: control target
= control target key end

     0   :  { %v354_v3 = vmov 0.0|0.0   ;;  %vm355_vm0 = vmmov 0   ;;  %v356_v6 = vmov 0.0   ;;  %s424_s0 = inlined_call_operand.vmem [shape: f32[8,32], index: 0, kind: input, shape index: {}]   ;;  %s425_s1 = inlined_call_operand.vmem [shape: f32[33,32], index: 1, kind: input, shape index: {}]   ;;  %s426_s2 = inlined_call_operand.vmem [shape: f32[24,16], index: 2, kind: input, shape index: {}]   ;;  %s427_s3 = inlined_call_operand.hbm [shape: f32[1,1,8], index: 3, kind: output, shape index: {}]  }
   0x1   :  { %v15_v0 = vld [vmem:[%s425_s1] sm:$0xff]  ;;  %v16_v1 = vld [vmem:[%s425_s1 + $0x8] sm:$0xff]  ;;  %v17_v2 = vld [vmem:[%s425_s1 + $0x10] sm:$0xff]  ;;  %316 = vmatprep.subr.bf16.mxu0 %v354_v3  ;;  %301 = vmatprep.mubr.msk.f32.mxu0 %vm355_vm0, %v356_v6 }
   0x2   :  { %v317_v4 = vpack.c.bf16 %v16_v1, %v15_v0  ;;  %v18_v5 = vld [vmem:[%s425_s1 + $0x18] sm:$0xff]  ;;  %322 = vmatprep.subr.bf16.mxu1 %v354_v3  ;;  %308 = vmatprep.mubr.msk.f32.mxu1 %vm355_vm0, %v356_v6 }
   0x3   :  { %8 = vsyncpa [#allocation3], 0  ;;  %v320_v7 = vpack.c.bf16 %v18_v5, %v17_v2  ;;  %v23_v8 = vld [vmem:[%s424_s0] sm:$0xff]  ;;  %vm28_vm1 = vcmask 261120   ;;  %v21_v10 = vld [vmem:[%s426_s2 + $0x8] sm:$0xff]  ;;  %vm107_vm2 = vcmask 130048   ;;  %v181_v17 = vlaneseq }
   0x4   :  { %318 = vmatpush3.bf16.msra.mxu0 %v317_v4  ;;  %v20_v9 = vld [vmem:[%s426_s2] sm:$0xff]  ;;  %s357_s0 = smov 112   ;;  %v22_v25 = vld [vmem:[%s426_s2 + $0x10] sm:$0x1]  ;;  %s358_s29 = smov [#allocation2]   ;;  %vm262_vm4 = vcmask 57344  }
   0x5   :  { %319 = vmatprep.subr.bf16.mxu0 %v354_v3  ;;  %v323_v11 = vpack.c.bf16 %v21_v10, %v20_v9  ;;  %v278_v12 = vld [vmem:[%s425_s1 + $0x20] ss:$0 sm:$0xff]  ;;  %v182_v18 = vand.u32 127, %v181_v17  ;;  %s270_s30 = sshll.u32 %s358_s29, 4  ;;  %s271_s30 = int_to_ptr.vmem [resolvable:$true] %s270_s30 }
   0x6   :  { %s330_s4 = scalar_lea.vmem %s271_s30, 16  ;;  %s334_s5 = scalar_lea.vmem %s271_s30, 32 }
   0x7   :  { %324 = vmatpush3.bf16.msra.mxu1 %v323_v11  ;;  %vm183_vm3 = vcmp.lt.s32.totalorder %v182_v18, 8  ;;  %p331_p0 = scmp.ne.s32.totalorder %s271_s30, %s330_s4  ;;  %p335_p1 = scmp.lt.s32.totalorder %s271_s30, %s271_s30 }
   0x8   :  { %321 = vmatpush3.bf16.msra.mxu0 %v320_v7  ;;  %311 = vmatprep.subr.mxu1 %v356_v6  ;;  %p336_p2 = scmp.lt.s32.totalorder %s334_s5, %s330_s4 }
   0xa   :  { %p337_p3 = por %p336_p2, %p335_p1 }
   0xb   :  { %302 = vmatmul.mubr.msk.f32.vlgmr.msra.gmra.mrb[0].mxu0 %vm28_vm1, %v23_v8 }
   0xc   :  { %p338_p4 = pnand %p337_p3, %p331_p0 }
  0xde   :  { %v98_v13 = vpop.f32.mrb[0].mxu0 }
  0xdf   :  { %v99_v14 = vadd.f32 %v278_v12, %v98_v13  ;;  %v303_v15 = vpop.f32.mrb[1].mxu0 }
  0xe1   :  { %v102_v16 = vmax.f32 %v99_v14, 0.0  ;;  %104 = vrot.lane.b32.xlu0 %v99_v14, %s357_s0 }
  0xe3   :  { %309 = vmatmul.mubr.msk.f32.vlgmr.msra.gmra.mrb[0].mxu1 %vm107_vm2, %v102_v16 }
  0xe4   :  { %313 = vmatprep.mubr.msk.f32.mxu1 %vm355_vm0, %v356_v6 }
 0x153   :  { %v105_v19 = vpop.permute.xlu0 %104 }
 0x1b6   :  { %v177_v20 = vpop.f32.mrb[0].mxu1 }
 0x1b7   :  { %v178_v21 = vadd.f32 %v177_v20, %v105_v19  ;;  %v310_v22 = vpop.f32.mrb[1].mxu1 }
 0x1b9   :  { %v184_v23 = vmax.f32 %v178_v21, 0.0 }
 0x1bb   :  { %v185_v24 = vsel %vm183_vm3, %v184_v23, %v178_v21 }
 0x1bc   :  { %312 = vmatpush3.xpose.msk.msra.mxu1 %vm107_vm2, %v185_v24 }
 0x1bf   :  { %314 = vmatmul.mubr.msk.f32.vlgmr.msra.gmra.mrb[2].mxu1 %vm107_vm2, %v22_v25 }
 0x292   :  { %v258_v26 = vpop.f32.mrb[2].mxu1 }
 0x293   :  { %263 = vst.msk [vmem:[#allocation2] sm:$0x1] %vm262_vm4, %v258_v26  ;;  %v315_v27 = vpop.f32.mrb[3].mxu1 }
 0x294   :  { %341 = shalt.err (!%p338_p4)
}
 0x295   :  { %s342_s2 = scalar_lea.hbm %s427_s3, 16 }
 0x296   :  { %p343_p5 = scmp.ne.s32.totalorder %s427_s3, %s342_s2  ;;  %p346_p6 = scmp.lt.u32.totalorder %s342_s2, %s427_s3 }
 0x298   :  { %p348_p7 = pnand %p346_p6, %p343_p5 }
 0x29a   :  { %351 = shalt.err (!%p348_p7)
}
 0x29b   :  { %273 = dma.vmem_to_hbm [thread:$0]  %s271_s30, 16, %s427_s3, [#allocation3]  }
 0x29c   :  { %352 = dma.done.wait [#allocation3], 16  }
 0x29d   :  { %353 = vsyncadd [#allocation3], 4294967280 }
 0x29e   :  { %277 = vsyncpa [#allocation3], 1 }

</bundles_post_ra>
